<compile_context>
chip_gen: v7x
topology: tpu7x:2x2x1
jax: 0.10.0
libtpu: 0.0.40
codegen_flags: <defaults>
</compile_context>

<pallas_src>
import functools

import jax
import jax.numpy as jnp
from jax import lax
from jax.experimental import pallas as pl
from jax.experimental.pallas import tpu as pltpu

ALPHA = 0.95  # synaptic decay
BETA = 0.90   # membrane decay

_UNROLL_LIMIT = 8  # fully unroll the recurrence for chunks this short


def _round_up(v, m):
    return (v + m - 1) // m * m


def _choose_chunk_steps(steps_per_label, batch_tile, in_pad, itemsize,
                        budget_bytes=4 * 1024 * 1024):
    """Largest divisor of steps_per_label whose x chunk fits the VMEM budget."""
    bytes_per_step = batch_tile * in_pad * itemsize
    max_steps = max(1, budget_bytes // bytes_per_step)
    if steps_per_label <= max_steps:
        return steps_per_label
    for c in range(int(max_steps), 0, -1):
        if steps_per_label % c == 0:
            return c
    return 1


def _choose_batch_tile(batch_pad, sub):
    """Batch-tile size: whole padded batch if small, else a <=256-row divisor."""
    if batch_pad <= 256:
        return batch_pad
    for t in range(256, sub - 1, -sub):
        if batch_pad % t == 0:
            return t
    return batch_pad


def _snn_decode_kernel(x_ref, w_ref, out_ref,
                       w_cache, i_ref, syn_ref, mem_ref, max_ref,
                       *, chunk_steps):
    """Grid = (batch_tiles [parallel], nb_labels, n_chunks) — last two sequential.

    x_ref   : (chunk_steps, batch_tile, in_pad)   compute dtype (bf16)
    w_ref   : (in_pad, out_pad)                   compute dtype
    out_ref : (1, batch_tile, out_pad) f32        same block across chunk axis
    w_cache : (in_pad, out_pad)                   scratch, compute dtype
    i_ref   : (chunk_steps, batch_tile, out_pad)  f32 scratch (fori path only)
    syn_ref, mem_ref, max_ref : (batch_tile, out_pad) f32 scratch
    """
    label = pl.program_id(1)
    chunk = pl.program_id(2)

    @pl.when(jnp.logical_and(label == 0, chunk == 0))
    def _():
        # First iteration for this batch tile (per core): cache W, reset state.
        w_cache[...] = w_ref[...]
        syn_ref[...] = jnp.zeros_like(syn_ref)
        mem_ref[...] = jnp.zeros_like(mem_ref)

    T, B, K = x_ref.shape
    N = w_cache.shape[1]

    # One tall MXU matmul covering every timestep of this chunk.
    x_flat = x_ref[...].reshape(T * B, K)
    i_all = jnp.dot(x_flat, w_cache[...],
                    preferred_element_type=jnp.float32).reshape(T, B, N)

    # Leaky-integrator recurrence (pure VPU) + chunk-local max over mem.
    syn = ALPHA * syn_ref[...] + i_all[0]
    mem = BETA * mem_ref[...] + syn
    chunk_max = mem

    if chunk_steps <= _UNROLL_LIMIT:
        for t in range(1, chunk_steps):
            syn = ALPHA * syn + i_all[t]
            mem = BETA * mem + syn
            chunk_max = jnp.maximum(chunk_max, mem)
    else:
        i_ref[...] = i_all

        def body(t, carry):
            s, m, mx = carry
            s = ALPHA * s + i_ref[t]
            m = BETA * m + s
            return s, m, jnp.maximum(mx, m)

        syn, mem, chunk_max = lax.fori_loop(
            1, chunk_steps, body, (syn, mem, chunk_max), unroll=4)

    syn_ref[...] = syn
    mem_ref[...] = mem

    @pl.when(chunk == 0)
    def _():
        max_ref[...] = chunk_max

    @pl.when(chunk > 0)
    def _():
        max_ref[...] = jnp.maximum(max_ref[...], chunk_max)

    @pl.when(chunk == pl.num_programs(2) - 1)
    def _():
        out_ref[...] = max_ref[...][None]


def ff_snn_model(x, w, *, nb_labels, compute_dtype=jnp.bfloat16):
    """x: (nb_steps, batch, nb_inputs); w: (nb_inputs, nb_outputs).

    Returns decoded output: (nb_labels, batch, nb_outputs), float32.
    """
    nb_steps, batch, nb_in = x.shape
    nb_out = w.shape[1]
    assert nb_steps % nb_labels == 0, "nb_steps must be divisible by nb_labels"
    steps_per_label = nb_steps // nb_labels

    itemsize = jnp.dtype(compute_dtype).itemsize
    sub = 8 * (4 // itemsize)          # 8 sublanes for f32, 16 for bf16
    batch_pad = _round_up(batch, sub)
    in_pad = _round_up(nb_in, 128)
    out_pad = _round_up(nb_out, 128)

    batch_tile = _choose_batch_tile(batch_pad, sub)
    n_batch_tiles = batch_pad // batch_tile

    chunk_steps = _choose_chunk_steps(steps_per_label, batch_tile, in_pad, itemsize)
    n_chunks = steps_per_label // chunk_steps

    # Pad to lane/sublane-dense shapes (zero padding doesn't affect results).
    xp = jnp.zeros((nb_steps, batch_pad, in_pad), compute_dtype)
    xp = xp.at[:, :batch, :nb_in].set(x.astype(compute_dtype))
    wp = jnp.zeros((in_pad, out_pad), compute_dtype)
    wp = wp.at[:nb_in, :nb_out].set(w.astype(compute_dtype))

    kernel = functools.partial(_snn_decode_kernel, chunk_steps=chunk_steps)

    # Explicit scoped-VMEM budget (double-buffered inputs/output + scratch).
    vmem_need = (
        2 * chunk_steps * batch_tile * in_pad * itemsize      # x, double-buffered
        + 2 * in_pad * out_pad * itemsize                     # w, double-buffered
        + 2 * batch_tile * out_pad * 4                        # out, double-buffered
        + in_pad * out_pad * itemsize                         # w cache
        + chunk_steps * batch_tile * out_pad * 4              # I scratch
        + 3 * batch_tile * out_pad * 4                        # syn / mem / max
    )
    vmem_limit = int(min(max(2 * vmem_need, 32 * 1024 * 1024), 64 * 1024 * 1024))

    out_padded = pl.pallas_call(
        kernel,
        out_shape=jax.ShapeDtypeStruct((nb_labels, batch_pad, out_pad), jnp.float32),
        grid_spec=pltpu.PrefetchScalarGridSpec(
            num_scalar_prefetch=0,
            grid=(n_batch_tiles, nb_labels, n_chunks),
            in_specs=[
                pl.BlockSpec((chunk_steps, batch_tile, in_pad),
                             lambda b, l, c: (l * n_chunks + c, b, 0)),
                pl.BlockSpec((in_pad, out_pad), lambda b, l, c: (0, 0)),
            ],
            out_specs=pl.BlockSpec((1, batch_tile, out_pad),
                                   lambda b, l, c: (l, b, 0)),
            scratch_shapes=[
                pltpu.VMEM((in_pad, out_pad), compute_dtype),                 # W cache
                pltpu.VMEM((chunk_steps, batch_tile, out_pad), jnp.float32),  # I
                pltpu.VMEM((batch_tile, out_pad), jnp.float32),               # syn
                pltpu.VMEM((batch_tile, out_pad), jnp.float32),               # mem
                pltpu.VMEM((batch_tile, out_pad), jnp.float32),               # max
            ],
        ),
        compiler_params=pltpu.CompilerParams(
            # Batch tiles are independent -> parallel (v7x 2nd TensorCore);
            # label & chunk axes carry syn/mem state -> arbitrary (sequential).
            dimension_semantics=("parallel", "arbitrary", "arbitrary"),
            vmem_limit_bytes=vmem_limit,
        ),
    )(xp, wp)

    return out_padded[:, :batch, :nb_out]


def ff_snn_model_ref(x, w, *, nb_labels):
    """Pure-JAX reference matching the PyTorch semantics."""
    nb_steps, batch, nb_in = x.shape
    nb_out = w.shape[1]

    def step(carry, x_t):
        syn, mem = carry
        i_t = x_t.astype(jnp.float32) @ w.astype(jnp.float32)
        syn = ALPHA * syn + i_t
        mem = BETA * mem + syn
        return (syn, mem), mem

    init = (jnp.zeros((batch, nb_out), jnp.float32),
            jnp.zeros((batch, nb_out), jnp.float32))
    _, mem_rec = jax.lax.scan(step, init, x)          # (nb_steps, batch, nb_out)
    steps_per_label = nb_steps // nb_labels
    mem_rec = mem_rec.reshape(nb_labels, steps_per_label, batch, nb_out)
    return jnp.max(mem_rec, axis=1)                   # (nb_labels, batch, nb_out)


if __name__ == "__main__":
    # Small, decode-consistent shapes.
    nb_steps, batch, nb_inputs, nb_outputs, nb_labels = 8, 2, 32, 4, 4

    key = jax.random.PRNGKey(0)
    kx, kw = jax.random.split(key)
    # Spike-like binary input, time-major.
    x = (jax.random.uniform(kx, (nb_steps, batch, nb_inputs)) < 0.3).astype(jnp.float32)
    w = jax.random.normal(kw, (nb_inputs, nb_outputs), jnp.float32) / jnp.sqrt(nb_inputs)
    # Pre-round W to bf16 so the bf16-compute kernel and the f32 reference agree.
    w = w.astype(jnp.bfloat16).astype(jnp.float32)

    out = ff_snn_model(x, w, nb_labels=nb_labels)
    out = jax.block_until_ready(out)

    ref = ff_snn_model_ref(x, w, nb_labels=nb_labels)
    assert out.shape == (nb_labels, batch, nb_outputs)
    assert jnp.allclose(out, ref, atol=1e-4, rtol=1e-4), "mismatch vs reference"

    print("KERNEL_OK")
</pallas_src>

<mosaic_0001>
module attributes {stable_mosaic.version = 11 : i64} {
  func.func @_snn_decode_kernel(%arg0: i32, %arg1: i32, %arg2: i32, %arg3: memref<2x16x128xbf16, #tpu.memory_space<vmem>>, %arg4: memref<128x128xbf16, #tpu.memory_space<vmem>>, %arg5: memref<1x16x128xf32, #tpu.memory_space<vmem>>, %arg6: memref<128x128xbf16, #tpu.memory_space<vmem>>, %arg7: memref<2x16x128xf32, #tpu.memory_space<vmem>>, %arg8: memref<16x128xf32, #tpu.memory_space<vmem>>, %arg9: memref<16x128xf32, #tpu.memory_space<vmem>>, %arg10: memref<16x128xf32, #tpu.memory_space<vmem>>) attributes {dimension_semantics = [#tpu.dimension_semantics<parallel>, #tpu.dimension_semantics<arbitrary>, #tpu.dimension_semantics<arbitrary>], iteration_bounds = array<i64: 1, 4, 1>, scalar_prefetch = 0 : i64, scratch_operands = 5 : i64, tpu.core_type = #tpu.core_type<tc>, window_params = [{transform_indices = @transform_0, window_bounds = array<i64: 2, 16, 128>}, {pipeline_mode = #tpu.pipeline_mode<synchronous>, transform_indices = @transform_1, window_bounds = array<i64: 128, 128>}, {transform_indices = @transform_2, window_bounds = array<i64: 1, 16, 128>}]} {
    %c0_i32 = arith.constant 0 : i32
    %0 = arith.cmpi eq, %arg1, %c0_i32 : i32
    %c0_i32_0 = arith.constant 0 : i32
    %1 = arith.cmpi eq, %arg2, %c0_i32_0 : i32
    %2 = arith.andi %0, %1 : i1
    %3 = arith.extui %2 : i1 to i32
    %c0_i32_1 = arith.constant 0 : i32
    %4 = arith.cmpi ne, %3, %c0_i32_1 : i32
    scf.if %4 {
      %c0_24 = arith.constant 0 : index
      %c0_25 = arith.constant 0 : index
      %40 = vector.load %arg4[%c0_24, %c0_25] : memref<128x128xbf16, #tpu.memory_space<vmem>>, vector<128x128xbf16>
      %c0_26 = arith.constant 0 : index
      %c0_27 = arith.constant 0 : index
      %41 = vector.load %arg6[%c0_26, %c0_27] : memref<128x128xbf16, #tpu.memory_space<vmem>>, vector<128x128xbf16>
      tpu.vector_store %arg6[%c0_26, %c0_27], %40 {strides = array<i32>} : memref<128x128xbf16, #tpu.memory_space<vmem>>, vector<128x128xbf16>,
      %cst_28 = arith.constant 0.000000e+00 : f32
      %42 = vector.broadcast %cst_28 : f32 to vector<16x128xf32>
      %c0_29 = arith.constant 0 : index
      %c0_30 = arith.constant 0 : index
      %43 = vector.load %arg8[%c0_29, %c0_30] : memref<16x128xf32, #tpu.memory_space<vmem>>, vector<16x128xf32>
      tpu.vector_store %arg8[%c0_29, %c0_30], %42 {strides = array<i32>} : memref<16x128xf32, #tpu.memory_space<vmem>>, vector<16x128xf32>,
      %cst_31 = arith.constant 0.000000e+00 : f32
      %44 = vector.broadcast %cst_31 : f32 to vector<16x128xf32>
      %c0_32 = arith.constant 0 : index
      %c0_33 = arith.constant 0 : index
      %45 = vector.load %arg9[%c0_32, %c0_33] : memref<16x128xf32, #tpu.memory_space<vmem>>, vector<16x128xf32>
      tpu.vector_store %arg9[%c0_32, %c0_33], %44 {strides = array<i32>} : memref<16x128xf32, #tpu.memory_space<vmem>>, vector<16x128xf32>,
    } else {
    }
    %c0 = arith.constant 0 : index
    %c0_2 = arith.constant 0 : index
    %c0_3 = arith.constant 0 : index
    %5 = vector.load %arg3[%c0, %c0_2, %c0_3] : memref<2x16x128xbf16, #tpu.memory_space<vmem>>, vector<2x16x128xbf16>
    %6 = vector.shape_cast %5 : vector<2x16x128xbf16> to vector<32x128xbf16>
    %c0_4 = arith.constant 0 : index
    %c0_5 = arith.constant 0 : index
    %7 = vector.load %arg6[%c0_4, %c0_5] : memref<128x128xbf16, #tpu.memory_space<vmem>>, vector<128x128xbf16>
    %cst = arith.constant dense<0.000000e+00> : vector<32x128xf32>
    %8 = tpu.matmul %6, %7, %cst {dimension_numbers = #tpu.dot_dimension_numbers<[1], [0], [0], [1], [0, 0, 1, 1], [], []>} : vector<32x128xbf16>, vector<128x128xbf16>, vector<32x128xf32> -> vector<32x128xf32>
    %9 = vector.shape_cast %8 : vector<32x128xf32> to vector<2x16x128xf32>
    %c0_6 = arith.constant 0 : index
    %c0_7 = arith.constant 0 : index
    %10 = vector.load %arg8[%c0_6, %c0_7] : memref<16x128xf32, #tpu.memory_space<vmem>>, vector<16x128xf32>
    %cst_8 = arith.constant 0.949999988 : f32
    %11 = vector.broadcast %cst_8 : f32 to vector<16x128xf32>
    %12 = arith.mulf %11, %10 : vector<16x128xf32>
    %13 = vector.extract_strided_slice %9 {offsets = [0, 0, 0], sizes = [1, 16, 128], strides = [1, 1, 1]} : vector<2x16x128xf32> to vector<1x16x128xf32>
    %14 = vector.shape_cast %13 : vector<1x16x128xf32> to vector<16x128xf32>
    %15 = arith.addf %12, %14 : vector<16x128xf32>
    %c0_9 = arith.constant 0 : index
    %c0_10 = arith.constant 0 : index
    %16 = vector.load %arg9[%c0_9, %c0_10] : memref<16x128xf32, #tpu.memory_space<vmem>>, vector<16x128xf32>
    %cst_11 = arith.constant 0.899999976 : f32
    %17 = vector.broadcast %cst_11 : f32 to vector<16x128xf32>
    %18 = arith.mulf %17, %16 : vector<16x128xf32>
    %19 = arith.addf %18, %15 : vector<16x128xf32>
    %cst_12 = arith.constant 0.949999988 : f32
    %20 = vector.broadcast %cst_12 : f32 to vector<16x128xf32>
    %21 = arith.mulf %20, %15 : vector<16x128xf32>
    %22 = vector.extract_strided_slice %9 {offsets = [1, 0, 0], sizes = [1, 16, 128], strides = [1, 1, 1]} : vector<2x16x128xf32> to vector<1x16x128xf32>
    %23 = vector.shape_cast %22 : vector<1x16x128xf32> to vector<16x128xf32>
    %24 = arith.addf %21, %23 : vector<16x128xf32>
    %cst_13 = arith.constant 0.899999976 : f32
    %25 = vector.broadcast %cst_13 : f32 to vector<16x128xf32>
    %26 = arith.mulf %25, %19 : vector<16x128xf32>
    %27 = arith.addf %26, %24 : vector<16x128xf32>
    %28 = arith.maximumf %19, %27 : vector<16x128xf32>
    %c0_14 = arith.constant 0 : index
    %c0_15 = arith.constant 0 : index
    %29 = vector.load %arg8[%c0_14, %c0_15] : memref<16x128xf32, #tpu.memory_space<vmem>>, vector<16x128xf32>
    tpu.vector_store %arg8[%c0_14, %c0_15], %24 {strides = array<i32>} : memref<16x128xf32, #tpu.memory_space<vmem>>, vector<16x128xf32>,
    %c0_16 = arith.constant 0 : index
    %c0_17 = arith.constant 0 : index
    %30 = vector.load %arg9[%c0_16, %c0_17] : memref<16x128xf32, #tpu.memory_space<vmem>>, vector<16x128xf32>
    tpu.vector_store %arg9[%c0_16, %c0_17], %27 {strides = array<i32>} : memref<16x128xf32, #tpu.memory_space<vmem>>, vector<16x128xf32>,
    %c0_i32_18 = arith.constant 0 : i32
    %31 = arith.cmpi eq, %arg2, %c0_i32_18 : i32
    %32 = arith.extui %31 : i1 to i32
    %c0_i32_19 = arith.constant 0 : i32
    %33 = arith.cmpi ne, %32, %c0_i32_19 : i32
    scf.if %33 {
      %c0_24 = arith.constant 0 : index
      %c0_25 = arith.constant 0 : index
      %40 = vector.load %arg10[%c0_24, %c0_25] : memref<16x128xf32, #tpu.memory_space<vmem>>, vector<16x128xf32>
      tpu.vector_store %arg10[%c0_24, %c0_25], %28 {strides = array<i32>} : memref<16x128xf32, #tpu.memory_space<vmem>>, vector<16x128xf32>,
    } else {
    }
    %c0_i32_20 = arith.constant 0 : i32
    %34 = arith.cmpi sgt, %arg2, %c0_i32_20 : i32
    %35 = arith.extui %34 : i1 to i32
    %c0_i32_21 = arith.constant 0 : i32
    %36 = arith.cmpi ne, %35, %c0_i32_21 : i32
    scf.if %36 {
      %c0_24 = arith.constant 0 : index
      %c0_25 = arith.constant 0 : index
      %40 = vector.load %arg10[%c0_24, %c0_25] : memref<16x128xf32, #tpu.memory_space<vmem>>, vector<16x128xf32>
      %41 = arith.maximumf %40, %28 : vector<16x128xf32>
      %c0_26 = arith.constant 0 : index
      %c0_27 = arith.constant 0 : index
      %42 = vector.load %arg10[%c0_26, %c0_27] : memref<16x128xf32, #tpu.memory_space<vmem>>, vector<16x128xf32>
      tpu.vector_store %arg10[%c0_26, %c0_27], %41 {strides = array<i32>} : memref<16x128xf32, #tpu.memory_space<vmem>>, vector<16x128xf32>,
    } else {
    }
    %c0_i32_22 = arith.constant 0 : i32
    %37 = arith.cmpi eq, %arg2, %c0_i32_22 : i32
    %38 = arith.extui %37 : i1 to i32
    %c0_i32_23 = arith.constant 0 : i32
    %39 = arith.cmpi ne, %38, %c0_i32_23 : i32
    scf.if %39 {
      %c0_24 = arith.constant 0 : index
      %c0_25 = arith.constant 0 : index
      %40 = vector.load %arg10[%c0_24, %c0_25] : memref<16x128xf32, #tpu.memory_space<vmem>>, vector<16x128xf32>
      %41 = vector.shape_cast %40 : vector<16x128xf32> to vector<1x16x128xf32>
      %c0_26 = arith.constant 0 : index
      %c0_27 = arith.constant 0 : index
      %c0_28 = arith.constant 0 : index
      %42 = vector.load %arg5[%c0_26, %c0_27, %c0_28] : memref<1x16x128xf32, #tpu.memory_space<vmem>>, vector<1x16x128xf32>
      tpu.vector_store %arg5[%c0_26, %c0_27, %c0_28], %41 {strides = array<i32>} : memref<1x16x128xf32, #tpu.memory_space<vmem>>, vector<1x16x128xf32>,
    } else {
    }
    return
  }
  func.func @transform_0(%arg0: i32, %arg1: i32, %arg2: i32) -> (i32, i32, i32) {
    %c1_i32 = arith.constant 1 : i32
    %0 = arith.muli %arg1, %c1_i32 : i32
    %1 = arith.addi %0, %arg2 : i32
    %c0_i32 = arith.constant 0 : i32
    %c0_i32_0 = arith.constant 0 : i32
    return %1, %arg0, %c0_i32 : i32, i32, i32
  }
  func.func @transform_1(%arg0: i32, %arg1: i32, %arg2: i32) -> (i32, i32) {
    %c0_i32 = arith.constant 0 : i32
    %c0_i32_0 = arith.constant 0 : i32
    %c0_i32_1 = arith.constant 0 : i32
    return %c0_i32, %c0_i32_0 : i32, i32
  }
  func.func @transform_2(%arg0: i32, %arg1: i32, %arg2: i32) -> (i32, i32, i32) {
    %c0_i32 = arith.constant 0 : i32
    %c0_i32_0 = arith.constant 0 : i32
    return %arg1, %arg0, %c0_i32 : i32, i32, i32
  }
}

</mosaic_0001>

<bundles_post_ra>
// kernel: tpu_custom_call.1
= control target key start
LH: loop header
LB: loop body
LE: loop exit
PB: predicated region body
PF: predicated region fallthrough
CT: control target
= control target key end

     0   :  { %7 = vsyncpa [#allocation8], 0  ;;  %s1084_s0 = inlined_call_operand.hbm [shape: bf16[8,16,128], index: 0, kind: input, shape index: {}]   ;;  %s1085_s1 = inlined_call_operand.hbm [shape: bf16[128,128], index: 1, kind: input, shape index: {}]   ;;  %s1086_s2 = inlined_call_operand.hbm [shape: f32[4,16,128], index: 2, kind: output, shape index: {}]  }
   0x1   :  { %9 = vsyncpa [#allocation8 + $0x1], 0 }
   0x2   :  { %10 = vsyncpa [#allocation11], 0 }
   0x3   :  { %11 = vsyncpa [#allocation9], 0 }
   0x4   :  { %13 = vsyncpa [#allocation9 + $0x1], 0  ;;  %s851_s9 = smov 0   ;;  %s853_s10 = smov 0  }
   0x5   :  { %s855_s11 = smov 0   ;;  %s857_s12 = smov 0  }
   0x6   :  { %s859_s13 = smov 0   ;;  %s861_s14 = smov 0  }
   0x7 LB: > { %s531_s15 = sadd.s32 4294967295, %s826_s14   ;;  %s532_s16 = sadd.s32 4294967294, %s826_s14   ;;  %s826_s14 = sphi %s861_s14, %s19_s14   ;;  %s822_s13 = sphi %s859_s13, %s1109_s13   ;;  %s818_s12 = sphi %s857_s12, %s1108_s12   ;;  %s814_s11 = sphi %s855_s11, %s1107_s11   ;;  %s810_s10 = sphi %s853_s10, %s1106_s10   ;;  %s806_s9 = sphi %s851_s9, %s1105_s9  }
   0x8   : > { %p62_p0 = scmp.ne.s32.totalorder %s810_s10, %s806_s9  ;;  %p885_p1 = scmp.eq.s32.totalorder %s531_s15, 0 }
   0x9   : > { %p889_p2 = scmp.eq.s32.totalorder %s531_s15, 3  ;;  %p115_p3 = scmp.eq.s32.totalorder %s532_s16, 3 }
   0xa   : > { %s1091_s17 = scalar_select %p885_p1, 1, 0 }
   0xb   : > { %s1092_s18 = scalar_select %p889_p2, 1, 0 }
   0xc   : > { %p895_p4 = por %p885_p1, %p62_p0  ;;  %p533_p5 = scmp.ge.s32.totalorder %s826_s14, 1 }
   0xd   : > { %p900_p6 = por %p115_p3, %p62_p0  ;;  %p122_p7 = scmp.lt.s32.totalorder %s826_s14, 5 }
   0xe   : > { %s1093_s19 = scalar_select %p895_p4, 1, 0 }
   0xf   : > { %s1094_s20 = scalar_select %p900_p6, 1, 0 }
  0x10   : > { %p905_p8 = pnand %p533_p5, %p122_p7  ;;  %s828_s22 = smov [#allocation10]  }
  0x11   : > { %s134_s23 = sshll.u32 %s828_s22, 4  ;;  %s34_s25 = sadd.s32 1, %s822_s13  ;;  %s135_s23 = int_to_ptr.vmem [resolvable:$true] %s134_s23 }
  0x12   : > { %s1095_s21 = scalar_select %p905_p8, 1, 0 }
  0x13   : > { %p602_p9 = pneg %p905_p8  ;;  %s682_s28 = scalar_lea.hbm %s1085_s1, 1024 }
  0x14   : > { %p683_p11 = scmp.ne.s32.totalorder %s1085_s1, %s682_s28  ;;  %p689_p3 = scmp.lt.u32.totalorder %s682_s28, %s1085_s1 }
  0x15   : > { %p913_p10 = pnand %p602_p9, %p885_p1 }
  0x17   : > { %p684_p12 = pneg %p913_p10 }
  0x19   : > { %p685_p13 = pnand %p684_p12, %p683_p11 }
  0x1b   : > { %p686_p0 = pneg %p685_p13 }
  0x1d   : > { %p691_p5 = pnand %p689_p3, %p686_p0 }
  0x1f   : > { %694 = shalt.err (!%p691_p5)
}
  0x20   : > { %s695_s5 = scalar_lea.vmem %s135_s23, 1024  ;;  %p703_p1 = scmp.lt.s32.totalorder %s135_s23, %s135_s23 }
  0x21   : > { %p696_p7 = scmp.ne.s32.totalorder %s135_s23, %s695_s5  ;;  %p704_p4 = scmp.lt.s32.totalorder %s695_s5, %s695_s5 }
  0x23   : > { %p698_p9 = pnand %p696_p7, %p684_p12  ;;  %p705_p8 = por %p704_p4, %p703_p1 }
  0x25   : > { %p699_p6 = pneg %p698_p9 }
  0x27   : > { %p706_p2 = pnand %p705_p8, %p699_p6 }
  0x29   : > { %709 = shalt.err (!%p706_p2)
}
  0x2a   : > { %s829_s6 = smov 64   ;;  %s830_s7 = smov 4  }
  0x2b   : > { %605 = dma.hbm_to_vmem [thread:$0]  (!%p913_p10), %s1085_s1, 1024, %s135_s23, [#allocation11], %s829_s6, %s829_s6, %s830_s7  }
  0x2c   : > { %p36_p1 = scmp.ge.s32.totalorder %s34_s25, 4  ;;  %s49_s16 = sadd.s32 1, %s814_s11 }
  0x2d   : > { %p56_p2 = scmp.ne.s32.totalorder %s814_s11, %s810_s10  ;;  %p57_p4 = scmp.eq.s32.totalorder %s826_s14, 0 }
  0x2e   : > { %s1111_s25 = smov (%p36_p1, %s34_s25), 0  ;;  %p1098_p8 = scmp.ne.s32.totalorder %s1092_s18, 0 }
  0x2f   : > { %p943_p6 = por %p57_p4, %p56_p2  ;;  %s44_s26 = ssub.s32 %s822_s13, %s1111_s25 }
  0x30   : > { %p949_p11 = por %p1098_p8, %p56_p2  ;;  %p615_p12 = scmp.lt.s32.totalorder %s826_s14, 4 }
  0x31   : > { %p47_p10 = scmp.eq.s32.totalorder %s44_s26, 0  ;;  %s148_s23 = sand.u32 1, %s814_s11  }
  0x32   : > { %s536_s27 = sshll.u32 %s148_s23, 4  ;;  %s561_s29 = sshll.u32 %s822_s13, 8 }
  0x33   : > { %s958_s28 = scalar_select %p47_p10, %s814_s11, %s49_s16  }
  0x34   : > { %s964_s4 = scalar_lea.hbm %s1084_s0, %s561_s29  ;;  %s152_s18 = scalar_lea.vmem [#allocation7], %s536_s27 }
  0x35   : > { %s163_s5 = sshll.u32 %s152_s18, 4  ;;  %p970_p13 = pnand %p615_p12, %p943_p6  ;;  %s966_s5 = int_to_ptr.vmem [resolvable:$true] %s163_s5 }
  0x36   : > { %s974_s15 = scalar_lea.sflag [#allocation8], %s148_s23  ;;  %s710_s16 = scalar_lea.hbm %s964_s4, 256 }
  0x37   : > { %p711_p0 = scmp.ne.s32.totalorder %s964_s4, %s710_s16  ;;  %p712_p3 = pneg %p970_p13 }
  0x38   : > { %s715_s22 = scalar_lea.hbm %s1084_s0, 1024  ;;  %p716_p9 = scmp.lt.u32.totalorder %s964_s4, %s1084_s0 }
  0x39   : > { %p713_p5 = pnand %p712_p3, %p711_p0  ;;  %p717_p1 = scmp.lt.u32.totalorder %s715_s22, %s710_s16 }
  0x3a   : > { %p719_p4 = scmp.lt.u32.totalorder %s710_s16, %s964_s4 }
  0x3b   : > { %p714_p7 = pneg %p713_p5  ;;  %p718_p2 = por %p717_p1, %p716_p9 }
  0x3d   : > { %p720_p6 = por %p719_p4, %p718_p2 }
  0x3f   : > { %p721_p8 = pnand %p720_p6, %p714_p7 }
  0x41   : > { %724 = shalt.err (!%p721_p8)
}
  0x42   : > { %s725_s23 = scalar_lea.vmem %s966_s5, 256  ;;  %s831_s3 = smov [#allocation7]  }
  0x43   : > { %p726_p12 = scmp.ne.s32.totalorder %s966_s5, %s725_s23  ;;  %s730_s18 = sshll.u32 %s831_s3, 4  ;;  %s731_s18 = int_to_ptr.vmem [resolvable:$false] %s730_s18 }
  0x44   : > { %s732_s26 = scalar_lea.vmem %s731_s18, 512  ;;  %p733_p5 = scmp.lt.s32.totalorder %s966_s5, %s731_s18 }
  0x45   : > { %p728_p10 = pnand %p726_p12, %p712_p3  ;;  %p734_p9 = scmp.lt.s32.totalorder %s732_s26, %s725_s23 }
  0x47   : > { %p729_p0 = pneg %p728_p10  ;;  %p735_p1 = por %p734_p9, %p733_p5 }
  0x49   : > { %p736_p2 = pnand %p735_p1, %p729_p0 }
  0x4b   : > { %739 = shalt.err (!%p736_p2)
}
  0x4c   : > { %609 = dma.hbm_to_vmem [thread:$0]  (!%p970_p13), %s964_s4, 256, %s966_s5, %s974_s15, %s829_s6, %s829_s6, %s830_s7  }
  0x4d   : > { %p1101_p3 = scmp.ne.s32.totalorder %s1095_s21, 0 }
  0x4e   : > { %s1008_s16 = sand.u32 (!%p1101_p3), 1, %s810_s10   ;;  %p1102_p7 = scmp.ne.s32.totalorder (!%p1101_p3), %s1093_s19, 0 }
  0x4f   : > { %175 = sbr.rel (%p1101_p3) target bundleno = 374 (0x176), region = 28  ;;  %s541_s27 = sshll.u32 (!%p1101_p3), %s1008_s16, 4 }
  0x50   : > { %s178_s22 = scalar_lea.sflag (!%p1101_p3), [#allocation8], %s1008_s16  ;;  %s1012_s29 = scalar_lea.vmem (!%p1101_p3), [#allocation7], %s541_s27 }
  0x56   : > { %793 = dma.done.wait (%p1102_p7), %s178_s22, 256  }
  0x57   : > { %795 = vsyncadd (%p1102_p7), %s178_s22, 4294967040  ;;  %p1103_p13 = scmp.ne.s32.totalorder %s1091_s17, 0 }
  0x59   : > { %797 = dma.done.wait (%p1103_p13), [#allocation11], 1024  }
  0x5a   : > { %799 = vsyncadd (%p1103_p13), [#allocation11], 4294966272  ;;  %p211_p4 = scmp.eq.s32.totalorder %s818_s12, 0  ;;  %s1023_s21 = scalar_lea.vmem [#allocation12], %s541_s27 }
  0x5b   : > { %v672_v0 = vld [vmem:[#allocation10] sm:$0xff] (%p211_p4)   ;;  %v673_v1 = vld [vmem:[#allocation10 + $0x8] sm:$0xff] (%p211_p4)   ;;  %v832_v2 = vmov (%p211_p4), 0.0   ;;  %v674_v3 = vld [vmem:[#allocation10 + $0x10] sm:$0xff] (%p211_p4)  }
  0x5c   : > { %216 = sbr.rel (!%p211_p4) target bundleno = 99 (0x63), region = 40  ;;  %289 = vst [vmem:[#allocation4] sm:$0xff] (%p211_p4), %v832_v2  ;;  %290 = vst [vmem:[#allocation4 + $0x8] sm:$0xff] (%p211_p4), %v832_v2  ;;  %v675_v4 = vld [vmem:[#allocation10 + $0x18] sm:$0xff] (%p211_p4)   ;;  %v676_v5 = vld [vmem:[#allocation10 + $0x20] sm:$0xff] (%p211_p4)  }
  0x5d   : > { %291 = vst [vmem:[#allocation5] sm:$0xff] (%p211_p4), %v832_v2  ;;  %292 = vst [vmem:[#allocation5 + $0x8] sm:$0xff] (%p211_p4), %v832_v2  ;;  %v677_v6 = vld [vmem:[#allocation10 + $0x28] sm:$0xff] (%p211_p4)   ;;  %v678_v7 = vld [vmem:[#allocation10 + $0x30] sm:$0xff] (%p211_p4)  }
  0x5e   : > { %281 = vst [vmem:[#allocation2] sm:$0xff] (%p211_p4), %v672_v0  ;;  %282 = vst [vmem:[#allocation2 + $0x8] sm:$0xff] (%p211_p4), %v673_v1  ;;  %v679_v8 = vld [vmem:[#allocation10 + $0x38] sm:$0xff] (%p211_p4)  }
  0x5f   : > { %283 = vst [vmem:[#allocation2 + $0x10] sm:$0xff] (%p211_p4), %v674_v3  ;;  %284 = vst [vmem:[#allocation2 + $0x18] sm:$0xff] (%p211_p4), %v675_v4 }
  0x60   : > { %285 = vst [vmem:[#allocation2 + $0x20] sm:$0xff] (%p211_p4), %v676_v5  ;;  %286 = vst [vmem:[#allocation2 + $0x28] sm:$0xff] (%p211_p4), %v677_v6 }
  0x61   : > { %287 = vst [vmem:[#allocation2 + $0x30] sm:$0xff] (%p211_p4), %v678_v7  ;;  %288 = vst [vmem:[#allocation2 + $0x38] sm:$0xff] (%p211_p4), %v679_v8 }
  0x63 PF: > { %v680_v11 = vld [vmem:[%s1012_s29] sm:$0xff]   ;;  %v681_v18 = vld [vmem:[%s1012_s29 + $0x8] sm:$0xff]   ;;  %s563_s17 = sshll.u32 %s818_s12, 8  ;;  %s430_s19 = sshll.u32 %s1023_s21, 4  ;;  %s1034_s19 = int_to_ptr.vmem [resolvable:$true] %s430_s19 }
  0x64   : > { %590 = vmatprep.mubr.bf16.mxu0 %v680_v11  ;;  %v366_v19 = vld [vmem:[#allocation4] sm:$0xff]  ;;  %v372_v20 = vld [vmem:[#allocation5] sm:$0xff]  ;;  %v367_v21 = vld [vmem:[#allocation4 + $0x8] sm:$0xff]  ;;  %s1032_s4 = scalar_lea.hbm %s1086_s2, %s563_s17  ;;  %s415_s12 = scalar_lea.sflag [#allocation9], %s1008_s16 }
  0x65   : > { %v297_v9 = vld [vmem:[#allocation2] sm:$0xff]  ;;  %v298_v10 = vld [vmem:[#allocation2 + $0x8] sm:$0xff]  ;;  %v368_v22 = vmul.f32 0.95, %v366_v19  ;;  %v373_v23 = vld [vmem:[#allocation5 + $0x8] sm:$0xff]  ;;  %s740_s5 = scalar_lea.vmem %s1034_s19, 256 }
  0x66   : > { %574 = vmatprep.subr.bf16.mxu0 %v297_v9  ;;  %v299_v12 = vld [vmem:[#allocation2 + $0x10] sm:$0xff]  ;;  %v300_v13 = vld [vmem:[#allocation2 + $0x18] sm:$0xff]  ;;  %v374_v25 = vmul.f32 0.9, %v372_v20  ;;  %v369_v26 = vmul.f32 0.95, %v367_v21  ;;  %p741_p6 = scmp.ne.s32.totalorder %s1034_s19, %s740_s5 }
  0x67   : > { %575 = vmatpush3.bf16.msra.mxu0 %v297_v9  ;;  %v301_v14 = vld [vmem:[#allocation2 + $0x20] sm:$0xff]  ;;  %v302_v15 = vld [vmem:[#allocation2 + $0x28] sm:$0xff]  ;;  %v375_v30 = vmul.f32 0.9, %v373_v23  ;;  %s833_s8 = smov [#allocation12]  }
  0x68   : > { %576 = vmatprep.subr.bf16.mxu0 %v298_v10  ;;  %v303_v16 = vld [vmem:[#allocation2 + $0x30] sm:$0xff]  ;;  %v304_v17 = vld [vmem:[#allocation2 + $0x38] sm:$0xff]  ;;  %p742_p8 = pnand %p741_p6, %p949_p11  ;;  %s744_s15 = sshll.u32 %s833_s8, 4  ;;  %s745_s15 = int_to_ptr.vmem [resolvable:$false] %s744_s15 }
  0x69   : > { %s746_s30 = scalar_lea.vmem %s745_s15, 512  ;;  %p747_p10 = scmp.lt.s32.totalorder %s1034_s19, %s745_s15 }
  0x6a   : > { %p743_p12 = pneg %p742_p8  ;;  %p748_p0 = scmp.lt.s32.totalorder %s746_s30, %s740_s5 }
  0x6b   : > { %577 = vmatpush3.bf16.msra.mxu0 %v298_v10 }
  0x6c   : > { %578 = vmatprep.subr.bf16.mxu0 %v299_v12  ;;  %p749_p5 = por %p748_p0, %p747_p10 }
  0x6e   : > { %p750_p9 = pnand %p749_p5, %p743_p12 }
  0x6f   : > { %579 = vmatpush3.bf16.msra.mxu0 %v299_v12 }
  0x70   : > { %580 = vmatprep.subr.bf16.mxu0 %v300_v13 }
  0x73   : > { %581 = vmatpush3.bf16.msra.mxu0 %v300_v13 }
  0x74   : > { %582 = vmatprep.subr.bf16.mxu0 %v301_v14 }
  0x77   : > { %583 = vmatpush3.bf16.msra.mxu0 %v301_v14 }
  0x78   : > { %584 = vmatprep.subr.bf16.mxu0 %v302_v15 }
  0x7b   : > { %585 = vmatpush3.bf16.msra.mxu0 %v302_v15 }
  0x7c   : > { %586 = vmatprep.subr.bf16.mxu0 %v303_v16 }
  0x7f   : > { %587 = vmatpush3.bf16.msra.mxu0 %v303_v16 }
  0x80   : > { %588 = vmatprep.subr.bf16.mxu0 %v304_v17 }
  0x83   : > { %589 = vmatpush3.bf16.msra.mxu0 %v304_v17 }
  0x86   : > { %591 = vmatmul.mubr.bf16.vlgmr.msra.gmra.mrb[0].mxu0 %v681_v18 }
 0x159   : > { %v592_v24 = vpop.f32.mrb[0].mxu0 }
 0x15a   : > { %v351_v27 = vpop.f32.mrb[1].mxu0 }
 0x15b   : > { %v370_v28 = vadd.f32 %v368_v22, %v351_v27  ;;  %v593_v29 = vpop.f32.mrb[2].mxu0 }
 0x15c   : > { %v354_v31 = vpop.f32.mrb[3].mxu0 }
 0x15d   : > { %v376_v32 = vadd.f32 %v374_v25, %v370_v28  ;;  %v378_v33 = vmul.f32 0.95, %v370_v28  ;;  %v371_v34 = vadd.f32 %v369_v26, %v354_v31 }
 0x15f   : > { %v380_v35 = vadd.f32 %v592_v24, %v378_v33  ;;  %v382_v36 = vmul.f32 0.9, %v376_v32  ;;  %v377_v37 = vadd.f32 %v375_v30, %v371_v34  ;;  %v379_v38 = vmul.f32 0.95, %v371_v34 }
 0x161   : > { %v384_v39 = vadd.f32 %v382_v36, %v380_v35  ;;  %388 = vst [vmem:[#allocation4] sm:$0xff] %v380_v35  ;;  %v381_v40 = vadd.f32 %v593_v29, %v379_v38  ;;  %v383_v41 = vmul.f32 0.9, %v377_v37 }
 0x163   : > { %v386_v42 = vmax.f32 %v376_v32, %v384_v39  ;;  %390 = vst [vmem:[#allocation5] sm:$0xff] %v384_v39  ;;  %v385_v43 = vadd.f32 %v383_v41, %v381_v40  ;;  %389 = vst [vmem:[#allocation4 + $0x8] sm:$0xff] %v381_v40 }
 0x165   : > { %412 = vst [vmem:[%s1023_s21] sm:$0xff] %v386_v42  ;;  %v387_v44 = vmax.f32 %v377_v37, %v385_v43  ;;  %391 = vst [vmem:[#allocation5 + $0x8] sm:$0xff] %v385_v43 }
 0x167   : > { %413 = vst [vmem:[%s1023_s21 + $0x8] sm:$0xff] %v387_v44 }
 0x168   : > { %753 = shalt.err (!%p750_p9)
}
 0x169   : > { %s754_s23 = scalar_lea.hbm %s1032_s4, 256  ;;  %s758_s26 = scalar_lea.hbm %s1086_s2, 1024 }
 0x16a   : > { %p755_p1 = scmp.ne.s32.totalorder %s1032_s4, %s754_s23  ;;  %p759_p7 = scmp.lt.u32.totalorder %s1032_s4, %s1086_s2 }
 0x16b   : > { %p760_p13 = scmp.lt.u32.totalorder %s758_s26, %s754_s23  ;;  %p762_p6 = scmp.lt.u32.totalorder %s754_s23, %s1032_s4 }
 0x16c   : > { %p756_p2 = pnand %p755_p1, %p949_p11 }
 0x16d   : > { %p761_p4 = por %p760_p13, %p759_p7 }
 0x16e   : > { %p757_p3 = pneg %p756_p2 }
 0x16f   : > { %p763_p8 = por %p762_p6, %p761_p4 }
 0x171   : > { %p764_p12 = pnand %p763_p8, %p757_p3 }
 0x173   : > { %767 = shalt.err (!%p764_p12)
}
 0x174   : > { %s834_s29 = smov 128   ;;  %s835_s21 = smov 8  }
 0x175   : > { %600 = dma.vmem_to_hbm [thread:$0]  (%p949_p11), %s1034_s19, 256, %s1032_s4, %s415_s12, %s834_s29, %s834_s29, %s835_s21  }
 0x176 PF: > { %p617_p10 = scmp.ge.s32.totalorder %s826_s14, 2  ;;  %s445_s17 = sand.u32 1, %s806_s9  }
 0x177   : > { %p1104_p0 = scmp.ne.s32.totalorder %s1094_s20, 0  ;;  %s446_s6 = scalar_lea.sflag [#allocation9], %s445_s17 }
 0x179   : > { %p611_p5 = pnand %p617_p10, %p1104_p0 }
 0x17b   : > { %801 = dma.done.wait (!%p611_p5), %s446_s6, 256  }
 0x17c   : > { %803 = vsyncadd (!%p611_p5), %s446_s6, 4294967040  ;;  %s19_s14 = sadd.s32 1, %s826_s14   ;;  %s1105_s9 = smov %s810_s10 }
 0x17d   : > { %p16_p9 = scmp.ge.s32.totalorder %s19_s14, 6   ;;  %s1106_s10 = smov %s814_s11 }
 0x17e   : > { %s1107_s11 = smov %s958_s28  ;;  %s1108_s12 = smov %s822_s13 }
 0x17f   : > { %s1109_s13 = smov %s1111_s25  ;;  %18 = sbr.rel (!%p16_p9) target bundleno = 7 (0x7), region = 93 }
 0x186   :  { %451 = vsyncpa [#allocation8], 1 }
 0x187   :  { %453 = vsyncpa [#allocation8 + $0x1], 1 }
 0x188   :  { %454 = vsyncpa [#allocation11], 1 }
 0x189   :  { %455 = vsyncpa [#allocation9], 1 }
 0x18a   :  { %457 = vsyncpa [#allocation9 + $0x1], 1 }

</bundles_post_ra>
